<compile_context>
chip_gen: v6e
topology: v6e:2x2x1
jax: 0.10.0
libtpu: 0.0.40
codegen_flags: <defaults>
</compile_context>

<pallas_src>
import functools
import math
from typing import NamedTuple, Tuple

import jax
import jax.numpy as jnp
from jax.experimental import pallas as pl
from jax.experimental.pallas import tpu as pltpu

_LANE = 128
_SUBLANE = 8
_MIB = 1024 * 1024


def _round_up(x, m):
    return ((x + m - 1) // m) * m


def _mlp_softmax_kernel(*refs, num_layers):
    """refs = (x_ref, w0, b0, ..., w_{L-1}, b_{L-1}, out_ref).

    All Linear layers, ReLUs and the final softmax fused: matmuls on the MXU
    (bf16 or f32 inputs, f32 accumulate), ReLU/softmax elementwise in f32,
    row reductions stay in VMEM.  Padded logit columns carry bias -1e30 (f32),
    so exp() underflows to exactly 0 and they contribute nothing to the softmax.
    """
    x_ref = refs[0]
    out_ref = refs[-1]
    params = refs[1:-1]

    h = x_ref[...].astype(jnp.float32)
    for i in range(num_layers):
        w_ref = params[2 * i]
        b_ref = params[2 * i + 1]                  # (1, out_pad) float32
        h = jnp.dot(h.astype(w_ref.dtype), w_ref[...],
                    preferred_element_type=jnp.float32) + b_ref[...]
        if i < num_layers - 1:                     # ReLU after every layer but last
            h = jnp.maximum(h, 0.0)

    # Softmax over dim=1 (features), exact f32 normalization so rows sum to 1.
    m = jnp.max(h, axis=1, keepdims=True)
    e = jnp.exp(h - m)
    denom = jnp.sum(e, axis=1, keepdims=True)
    inv = 1.0 / denom                              # exact divide (VPU); kernel is HBM-bound
    # TODO(synk): if output writeback still dominates after the bf16 switch, lane-pack
    # output_size columns of several rows into one 128-lane row before storing.
    out_ref[...] = (e * inv).astype(out_ref.dtype)


class PreparedParams(NamedTuple):
    flat: Tuple[jax.Array, ...]   # (w0, b0, w1, b1, ...) padded; weights in matmul_dtype
    num_layers: int
    input_size: int
    output_size: int
    out_pad: int


def init_mlp_params(key, input_size, output_size, depth, width):
    """Parameters matching the torch module's layer shapes, stored as (in, out)."""
    dims = [input_size] + [width] * (depth + 1) + [output_size]
    params = []
    for i in range(len(dims) - 1):
        key, kw, kb = jax.random.split(key, 3)
        bound = 1.0 / math.sqrt(dims[i])            # torch.nn.Linear default scale
        w = jax.random.uniform(kw, (dims[i], dims[i + 1]), jnp.float32, -bound, bound)
        b = jax.random.uniform(kb, (1, dims[i + 1]), jnp.float32, -bound, bound)
        params.append((w, b))
    return params


def prepare_params(params, *, matmul_dtype=jnp.bfloat16, pad_multiple=_LANE):
    """Pad + cast parameters ONCE (hoisted out of the per-call forward path).

    Feature dims are zero-padded to `pad_multiple` lanes (exact math: zero weights/bias
    -> zero activations -> zero contribution); the last layer's padded logit columns get
    bias -1e30 (kept strictly f32) so softmax assigns them probability 0.
    pad_multiple=128 matches the vreg lane width; use 256 for hidden widths >=256 on
    v6e/v7x (2x256x256 MXU) once the kernel is MXU-bound.
    """
    num_layers = len(params)
    input_size = params[0][0].shape[0]
    output_size = params[-1][0].shape[1]
    flat = []
    for i, (w, b) in enumerate(params):
        d_in, d_out = w.shape
        w = jnp.asarray(w, jnp.float32)
        b = jnp.asarray(b, jnp.float32).reshape(1, d_out)
        # Layer 0's K matches raw x columns (padding x per call would add HBM traffic
        # for a negligible win at small input_size).
        in_pad = d_in if i == 0 else _round_up(d_in, pad_multiple)
        out_pad = _round_up(d_out, pad_multiple)
        w_p = jnp.zeros((in_pad, out_pad), jnp.float32).at[:d_in, :d_out].set(w)
        if i == num_layers - 1:
            b_p = jnp.full((1, out_pad), -1e30, jnp.float32).at[:, :d_out].set(b)
        else:
            b_p = jnp.zeros((1, out_pad), jnp.float32).at[:, :d_out].set(b)
        flat.extend([w_p.astype(matmul_dtype), b_p])
    return PreparedParams(tuple(flat), num_layers, input_size, output_size,
                          flat[-2].shape[1])


def mlp_distribution_forward(x, prepared: PreparedParams, *, tb=1024,
                             out_dtype=jnp.bfloat16):
    batch, input_size = x.shape
    assert input_size == prepared.input_size
    num_layers = prepared.num_layers
    out_pad = prepared.out_pad
    flat = prepared.flat

    # Batch tiling: pad rows only to the 8-row sublane multiple; the grid uses cdiv so a
    # ragged last block is masked instead of padding batch to a tb multiple.  Cap tb so
    # the grid has >=2 steps whenever batch allows (v7x: both TensorCores get work).
    batch_p = _round_up(batch, _SUBLANE)
    if batch_p != batch:
        x = jnp.pad(x, ((0, batch_p - batch), (0, 0)))
    half = _round_up((batch_p + 1) // 2, _SUBLANE)
    tb = max(_SUBLANE, min(tb, half))
    grid = (pl.cdiv(batch_p, tb),)

    # Resident VMEM footprint: params single-buffered, x/out blocks double-buffered,
    # plus ~two f32 activation slabs of the widest layer.
    widths = [int(flat[2 * i].shape[1]) for i in range(num_layers)]
    param_bytes = sum(int(p.size) * p.dtype.itemsize for p in flat)
    io_bytes = 2 * (tb * input_size * x.dtype.itemsize
                    + tb * out_pad * jnp.dtype(out_dtype).itemsize)
    act_bytes = 2 * tb * max(widths + [input_size]) * 4
    vmem_needed = param_bytes + io_bytes + act_bytes
    # TODO(synk): stream weights per layer (extra grid axis / emit_pipeline) instead of
    # keeping them all resident once param_bytes exceeds ~24 MiB (v7x has 64 MiB VMEM).
    try:    # physical VMEM differs per generation (128 MiB v5e/v6e, 64 MiB v7x)
        vmem_ceiling = min(100 * _MIB,
                           int(pltpu.get_tpu_info().vmem_capacity_bytes) * 7 // 8)
    except Exception:   # interpret mode / CPU AOT: fall back to a v7x-safe ceiling
        vmem_ceiling = 56 * _MIB
    vmem_limit = int(min(vmem_ceiling, max(32 * _MIB, 2 * vmem_needed)))

    in_specs = [pl.BlockSpec((tb, input_size), lambda i: (i, 0))]
    for p in flat:
        # Constant index_map + single buffer -> each weight/bias is DMA'd once and stays
        # resident in VMEM across all batch grid steps (half the default 2x buffering).
        in_specs.append(
            pl.BlockSpec(p.shape, lambda i: (0, 0), pipeline_mode=pl.Buffered(1)))

    flops = 2 * batch_p * sum(
        int(flat[2 * i].shape[0]) * int(flat[2 * i].shape[1]) for i in range(num_layers))
    cost = pl.CostEstimate(
        flops=int(flops),
        transcendentals=int(batch_p * out_pad),
        bytes_accessed=int(int(x.size) * x.dtype.itemsize + param_bytes
                           + batch_p * out_pad * jnp.dtype(out_dtype).itemsize))

    kernel = functools.partial(_mlp_softmax_kernel, num_layers=num_layers)

    out = pl.pallas_call(
        kernel,
        out_shape=jax.ShapeDtypeStruct((batch_p, out_pad), out_dtype),
        grid=grid,
        in_specs=in_specs,
        out_specs=pl.BlockSpec((tb, out_pad), lambda i: (i, 0)),
        compiler_params=pltpu.CompilerParams(
            dimension_semantics=("parallel",),
            vmem_limit_bytes=vmem_limit),
        cost_estimate=cost,
    )(x, *flat)

    return out[:batch, :prepared.output_size]


def mlp_distribution_ref(x, params):
    """Pure-JAX f32 reference matching the PyTorch module."""
    h = x
    for i, (w, b) in enumerate(params):
        h = jnp.dot(h, w, precision=jax.lax.Precision.HIGHEST) + b
        if i < len(params) - 1:
            h = jnp.maximum(h, 0.0)
    return jax.nn.softmax(h, axis=1)


if __name__ == "__main__":
    key = jax.random.PRNGKey(0)
    k_params, k_x = jax.random.split(key)

    # Config: input_size=16, output_size=8, depth=2, width=32; batch=2.
    input_size, output_size, depth, width = 16, 8, 2, 32
    batch = 2

    params = init_mlp_params(k_params, input_size, output_size, depth, width)
    x = jax.random.normal(k_x, (batch, input_size), jnp.float32)

    ref = mlp_distribution_ref(x, params)

    # Exact path (f32 matmuls, f32 output): tight check against the reference.
    prep_f32 = prepare_params(params, matmul_dtype=jnp.float32)
    out_f32 = jax.block_until_ready(
        mlp_distribution_forward(x, prep_f32, out_dtype=jnp.float32))
    assert out_f32.shape == (batch, output_size)
    assert jnp.allclose(jnp.sum(out_f32, axis=1), 1.0, atol=1e-3)
    assert jnp.allclose(out_f32, ref, atol=1e-3, rtol=1e-3)

    # Default fast path (bf16 matmul inputs + bf16 output, f32 accumulate/softmax):
    # parameters padded & cast ONCE, reused across calls.
    prep = prepare_params(params)
    out_bf16 = jax.block_until_ready(mlp_distribution_forward(x, prep))
    assert out_bf16.shape == (batch, output_size)
    out_bf16 = out_bf16.astype(jnp.float32)
    assert jnp.allclose(jnp.sum(out_bf16, axis=1), 1.0, atol=3e-2)
    assert jnp.allclose(out_bf16, ref, atol=5e-2, rtol=5e-2)

    print("KERNEL_OK")
</pallas_src>

<mosaic_0001>
module attributes {stable_mosaic.version = 11 : i64} {
  func.func @_mlp_softmax_kernel(%arg0: i32, %arg1: memref<8x16xf32, #tpu.memory_space<vmem>>, %arg2: memref<16x128xf32, #tpu.memory_space<vmem>>, %arg3: memref<1x128xf32, #tpu.memory_space<vmem>>, %arg4: memref<128x128xf32, #tpu.memory_space<vmem>>, %arg5: memref<1x128xf32, #tpu.memory_space<vmem>>, %arg6: memref<128x128xf32, #tpu.memory_space<vmem>>, %arg7: memref<1x128xf32, #tpu.memory_space<vmem>>, %arg8: memref<128x128xf32, #tpu.memory_space<vmem>>, %arg9: memref<1x128xf32, #tpu.memory_space<vmem>>, %arg10: memref<8x128xf32, #tpu.memory_space<vmem>>) attributes {dimension_semantics = [#tpu.dimension_semantics<parallel>], iteration_bounds = array<i64: 1>, scalar_prefetch = 0 : i64, scratch_operands = 0 : i64, tpu.core_type = #tpu.core_type<tc>, window_params = [{transform_indices = @transform_0, window_bounds = array<i64: 8, 16>}, {pipeline_mode = #tpu.pipeline_mode<synchronous>, transform_indices = @transform_1, window_bounds = array<i64: 16, 128>}, {pipeline_mode = #tpu.pipeline_mode<synchronous>, transform_indices = @transform_2, window_bounds = array<i64: 1, 128>}, {pipeline_mode = #tpu.pipeline_mode<synchronous>, transform_indices = @transform_3, window_bounds = array<i64: 128, 128>}, {pipeline_mode = #tpu.pipeline_mode<synchronous>, transform_indices = @transform_4, window_bounds = array<i64: 1, 128>}, {pipeline_mode = #tpu.pipeline_mode<synchronous>, transform_indices = @transform_5, window_bounds = array<i64: 128, 128>}, {pipeline_mode = #tpu.pipeline_mode<synchronous>, transform_indices = @transform_6, window_bounds = array<i64: 1, 128>}, {pipeline_mode = #tpu.pipeline_mode<synchronous>, transform_indices = @transform_7, window_bounds = array<i64: 128, 128>}, {pipeline_mode = #tpu.pipeline_mode<synchronous>, transform_indices = @transform_8, window_bounds = array<i64: 1, 128>}, {transform_indices = @transform_9, window_bounds = array<i64: 8, 128>}]} {
    %c0 = arith.constant 0 : index
    %c0_0 = arith.constant 0 : index
    %0 = vector.load %arg1[%c0, %c0_0] : memref<8x16xf32, #tpu.memory_space<vmem>>, vector<8x16xf32>
    %c0_1 = arith.constant 0 : index
    %c0_2 = arith.constant 0 : index
    %1 = vector.load %arg2[%c0_1, %c0_2] : memref<16x128xf32, #tpu.memory_space<vmem>>, vector<16x128xf32>
    %cst = arith.constant dense<0.000000e+00> : vector<8x128xf32>
    %2 = tpu.matmul %0, %1, %cst {dimension_numbers = #tpu.dot_dimension_numbers<[1], [0], [0], [1], [0, 0, 1, 1], [], []>} : vector<8x16xf32>, vector<16x128xf32>, vector<8x128xf32> -> vector<8x128xf32>
    %c0_3 = arith.constant 0 : index
    %c0_4 = arith.constant 0 : index
    %3 = vector.load %arg3[%c0_3, %c0_4] : memref<1x128xf32, #tpu.memory_space<vmem>>, vector<1x128xf32>
    %4 = vector.broadcast %3 : vector<1x128xf32> to vector<8x128xf32>
    %5 = arith.addf %2, %4 : vector<8x128xf32>
    %cst_5 = arith.constant 0.000000e+00 : f32
    %6 = vector.broadcast %cst_5 : f32 to vector<8x128xf32>
    %7 = arith.maximumf %5, %6 : vector<8x128xf32>
    %c0_6 = arith.constant 0 : index
    %c0_7 = arith.constant 0 : index
    %8 = vector.load %arg4[%c0_6, %c0_7] : memref<128x128xf32, #tpu.memory_space<vmem>>, vector<128x128xf32>
    %cst_8 = arith.constant dense<0.000000e+00> : vector<8x128xf32>
    %9 = tpu.matmul %7, %8, %cst_8 {dimension_numbers = #tpu.dot_dimension_numbers<[1], [0], [0], [1], [0, 0, 1, 1], [], []>} : vector<8x128xf32>, vector<128x128xf32>, vector<8x128xf32> -> vector<8x128xf32>
    %c0_9 = arith.constant 0 : index
    %c0_10 = arith.constant 0 : index
    %10 = vector.load %arg5[%c0_9, %c0_10] : memref<1x128xf32, #tpu.memory_space<vmem>>, vector<1x128xf32>
    %11 = vector.broadcast %10 : vector<1x128xf32> to vector<8x128xf32>
    %12 = arith.addf %9, %11 : vector<8x128xf32>
    %cst_11 = arith.constant 0.000000e+00 : f32
    %13 = vector.broadcast %cst_11 : f32 to vector<8x128xf32>
    %14 = arith.maximumf %12, %13 : vector<8x128xf32>
    %c0_12 = arith.constant 0 : index
    %c0_13 = arith.constant 0 : index
    %15 = vector.load %arg6[%c0_12, %c0_13] : memref<128x128xf32, #tpu.memory_space<vmem>>, vector<128x128xf32>
    %cst_14 = arith.constant dense<0.000000e+00> : vector<8x128xf32>
    %16 = tpu.matmul %14, %15, %cst_14 {dimension_numbers = #tpu.dot_dimension_numbers<[1], [0], [0], [1], [0, 0, 1, 1], [], []>} : vector<8x128xf32>, vector<128x128xf32>, vector<8x128xf32> -> vector<8x128xf32>
    %c0_15 = arith.constant 0 : index
    %c0_16 = arith.constant 0 : index
    %17 = vector.load %arg7[%c0_15, %c0_16] : memref<1x128xf32, #tpu.memory_space<vmem>>, vector<1x128xf32>
    %18 = vector.broadcast %17 : vector<1x128xf32> to vector<8x128xf32>
    %19 = arith.addf %16, %18 : vector<8x128xf32>
    %cst_17 = arith.constant 0.000000e+00 : f32
    %20 = vector.broadcast %cst_17 : f32 to vector<8x128xf32>
    %21 = arith.maximumf %19, %20 : vector<8x128xf32>
    %c0_18 = arith.constant 0 : index
    %c0_19 = arith.constant 0 : index
    %22 = vector.load %arg8[%c0_18, %c0_19] : memref<128x128xf32, #tpu.memory_space<vmem>>, vector<128x128xf32>
    %cst_20 = arith.constant dense<0.000000e+00> : vector<8x128xf32>
    %23 = tpu.matmul %21, %22, %cst_20 {dimension_numbers = #tpu.dot_dimension_numbers<[1], [0], [0], [1], [0, 0, 1, 1], [], []>} : vector<8x128xf32>, vector<128x128xf32>, vector<8x128xf32> -> vector<8x128xf32>
    %c0_21 = arith.constant 0 : index
    %c0_22 = arith.constant 0 : index
    %24 = vector.load %arg9[%c0_21, %c0_22] : memref<1x128xf32, #tpu.memory_space<vmem>>, vector<1x128xf32>
    %25 = vector.broadcast %24 : vector<1x128xf32> to vector<8x128xf32>
    %26 = arith.addf %23, %25 : vector<8x128xf32>
    %cst_23 = arith.constant dense<0xFF800000> : vector<8xf32>
    %27 = vector.multi_reduction <maximumf>, %26, %cst_23 [1] : vector<8x128xf32> to vector<8xf32>
    %28 = vector.shape_cast %27 : vector<8xf32> to vector<8x1xf32>
    %29 = vector.broadcast %28 : vector<8x1xf32> to vector<8x128xf32>
    %30 = arith.subf %26, %29 : vector<8x128xf32>
    %31 = math.exp %30 : vector<8x128xf32>
    %cst_24 = arith.constant dense<0.000000e+00> : vector<8xf32>
    %32 = vector.multi_reduction <add>, %31, %cst_24 [1] : vector<8x128xf32> to vector<8xf32>
    %33 = vector.shape_cast %32 : vector<8xf32> to vector<8x1xf32>
    %cst_25 = arith.constant 1.000000e+00 : f32
    %34 = vector.broadcast %cst_25 : f32 to vector<8x1xf32>
    %35 = arith.divf %34, %33 : vector<8x1xf32>
    %36 = vector.broadcast %35 : vector<8x1xf32> to vector<8x128xf32>
    %37 = arith.mulf %31, %36 : vector<8x128xf32>
    %c0_26 = arith.constant 0 : index
    %c0_27 = arith.constant 0 : index
    %38 = vector.load %arg10[%c0_26, %c0_27] : memref<8x128xf32, #tpu.memory_space<vmem>>, vector<8x128xf32>
    tpu.vector_store %arg10[%c0_26, %c0_27], %37 {strides = array<i32>} : memref<8x128xf32, #tpu.memory_space<vmem>>, vector<8x128xf32>,
    return
  }
  func.func @transform_0(%arg0: i32) -> (i32, i32) {
    %c0_i32 = arith.constant 0 : i32
    %c0_i32_0 = arith.constant 0 : i32
    return %arg0, %c0_i32 : i32, i32
  }
  func.func @transform_1(%arg0: i32) -> (i32, i32) {
    %c0_i32 = arith.constant 0 : i32
    %c0_i32_0 = arith.constant 0 : i32
    %c0_i32_1 = arith.constant 0 : i32
    return %c0_i32, %c0_i32_0 : i32, i32
  }
  func.func @transform_2(%arg0: i32) -> (i32, i32) {
    %c0_i32 = arith.constant 0 : i32
    %c0_i32_0 = arith.constant 0 : i32
    %c0_i32_1 = arith.constant 0 : i32
    return %c0_i32, %c0_i32_0 : i32, i32
  }
  func.func @transform_3(%arg0: i32) -> (i32, i32) {
    %c0_i32 = arith.constant 0 : i32
    %c0_i32_0 = arith.constant 0 : i32
    %c0_i32_1 = arith.constant 0 : i32
    return %c0_i32, %c0_i32_0 : i32, i32
  }
  func.func @transform_4(%arg0: i32) -> (i32, i32) {
    %c0_i32 = arith.constant 0 : i32
    %c0_i32_0 = arith.constant 0 : i32
    %c0_i32_1 = arith.constant 0 : i32
    return %c0_i32, %c0_i32_0 : i32, i32
  }
  func.func @transform_5(%arg0: i32) -> (i32, i32) {
    %c0_i32 = arith.constant 0 : i32
    %c0_i32_0 = arith.constant 0 : i32
    %c0_i32_1 = arith.constant 0 : i32
    return %c0_i32, %c0_i32_0 : i32, i32
  }
  func.func @transform_6(%arg0: i32) -> (i32, i32) {
    %c0_i32 = arith.constant 0 : i32
    %c0_i32_0 = arith.constant 0 : i32
    %c0_i32_1 = arith.constant 0 : i32
    return %c0_i32, %c0_i32_0 : i32, i32
  }
  func.func @transform_7(%arg0: i32) -> (i32, i32) {
    %c0_i32 = arith.constant 0 : i32
    %c0_i32_0 = arith.constant 0 : i32
    %c0_i32_1 = arith.constant 0 : i32
    return %c0_i32, %c0_i32_0 : i32, i32
  }
  func.func @transform_8(%arg0: i32) -> (i32, i32) {
    %c0_i32 = arith.constant 0 : i32
    %c0_i32_0 = arith.constant 0 : i32
    %c0_i32_1 = arith.constant 0 : i32
    return %c0_i32, %c0_i32_0 : i32, i32
  }
  func.func @transform_9(%arg0: i32) -> (i32, i32) {
    %c0_i32 = arith.constant 0 : i32
    %c0_i32_0 = arith.constant 0 : i32
    return %arg0, %c0_i32 : i32, i32
  }
}

</mosaic_0001>

<bundles_post_ra>
// kernel: tpu_custom_call.1
= control target key start
LH: loop header
LB: loop body
LE: loop exit
PB: predicated region body
PF: predicated region fallthrough
CT: control target
= control target key end

     0   :  { %14 = vsyncpa [#allocation3], 0  ;;  %s966_s0 = inlined_call_operand.hbm [shape: f32[8,16], index: 0, kind: input, shape index: {}]   ;;  %s967_s1 = inlined_call_operand.hbm [shape: f32[16,128], index: 1, kind: input, shape index: {}]   ;;  %s968_s2 = inlined_call_operand.vmem [shape: f32[1,128], index: 2, kind: input, shape index: {}]   ;;  %s969_s3 = inlined_call_operand.hbm [shape: f32[128,128], index: 3, kind: input, shape index: {}]   ;;  %s970_s4 = inlined_call_operand.vmem [shape: f32[1,128], index: 4, kind: input, shape index: {}]   ;;  %s971_s5 = inlined_call_operand.hbm [shape: f32[128,128], index: 5, kind: input, shape index: {}]   ;;  %s972_s6 = inlined_call_operand.vmem [shape: f32[1,128], index: 6, kind: input, shape index: {}]   ;;  %s973_s7 = inlined_call_operand.hbm [shape: f32[128,128], index: 7, kind: input, shape index: {}]   ;;  %s974_s8 = inlined_call_operand.vmem [shape: f32[1,128], index: 8, kind: input, shape index: {}]   ;;  %s975_s9 = inlined_call_operand.hbm [shape: f32[8,128], index: 9, kind: output, shape index: {}]  }
   0x1   :  { %15 = vsyncpa [#allocation6], 0 }
   0x2   :  { %16 = vsyncpa [#allocation9], 0 }
   0x3   :  { %17 = vsyncpa [#allocation4], 0  ;;  %s806_s30 = smov [#allocation5]  }
   0x4   :  { %s33_s10 = sshll.u32 %s806_s30, 4  ;;  %s34_s10 = int_to_ptr.vmem [resolvable:$true] %s33_s10 }
   0x5   :  { %s686_s11 = scalar_lea.vmem %s34_s10, 256  ;;  %p691_p1 = scmp.lt.s32.totalorder %s34_s10, %s34_s10 }
   0x6   :  { %p687_p0 = scmp.ne.s32.totalorder %s34_s10, %s686_s11  ;;  %p692_p2 = scmp.lt.s32.totalorder %s686_s11, %s686_s11 }
   0x8   :  { %p693_p3 = por %p692_p2, %p691_p1 }
   0xa   :  { %p694_p4 = pnand %p693_p3, %p687_p0 }
   0xc   :  { %697 = shalt.err (!%p694_p4)
}
   0xd   :  { %s807_s12 = smov 128   ;;  %s808_s13 = smov 8  }
   0xe   :  { %39 = dma.hbm_to_vmem [thread:$0]  %s967_s1, 256, %s34_s10, [#allocation6], %s807_s12, %s807_s12, %s808_s13  }
   0xf   :  { %s809_s16 = smov [#allocation8]   ;;  %s810_s18 = smov [#allocation2]  }
  0x10   :  { %s61_s17 = sshll.u32 %s809_s16, 4  ;;  %s24_s19 = sshll.u32 %s810_s18, 4  ;;  %s62_s17 = int_to_ptr.vmem [resolvable:$true] %s61_s17  ;;  %s25_s19 = int_to_ptr.vmem [resolvable:$true] %s24_s19 }
  0x11   :  { %s706_s20 = scalar_lea.vmem %s62_s17, 2048  ;;  %p711_p6 = scmp.lt.s32.totalorder %s62_s17, %s62_s17 }
  0x12   :  { %p707_p5 = scmp.ne.s32.totalorder %s62_s17, %s706_s20  ;;  %p712_p7 = scmp.lt.s32.totalorder %s706_s20, %s706_s20 }
  0x14   :  { %p713_p8 = por %p712_p7, %p711_p6 }
  0x16   :  { %p714_p9 = pnand %p713_p8, %p707_p5 }
  0x18   :  { %717 = shalt.err (!%p714_p9)
}
  0x19   :  { %67 = dma.hbm_to_vmem [thread:$0]  %s971_s5, 2048, %s62_s17, [#allocation9], %s807_s12, %s807_s12, %s808_s13  }
  0x1a   :  { %s726_s1 = scalar_lea.vmem %s25_s19, 128  ;;  %p731_p11 = scmp.lt.s32.totalorder %s25_s19, %s25_s19 }
  0x1b   :  { %p727_p10 = scmp.ne.s32.totalorder %s25_s19, %s726_s1  ;;  %p732_p12 = scmp.lt.s32.totalorder %s726_s1, %s726_s1 }
  0x1d   :  { %p733_p13 = por %p732_p12, %p731_p11 }
  0x1f   :  { %p734_p0 = pnand %p733_p13, %p727_p10 }
  0x21   :  { %737 = shalt.err (!%p734_p0)
}
  0x22   :  { %27 = dma.hbm_to_vmem [thread:$0]  %s966_s0, 128, %s25_s19, [#allocation3]  }
  0x23   :  { %s811_s25 = smov [#allocation7]   ;;  %s812_s27 = smov [#allocation10]  }
  0x24   :  { %s47_s26 = sshll.u32 %s811_s25, 4  ;;  %s75_s28 = sshll.u32 %s812_s27, 4  ;;  %s48_s26 = int_to_ptr.vmem [resolvable:$true] %s47_s26  ;;  %s76_s28 = int_to_ptr.vmem [resolvable:$true] %s75_s28 }
  0x25   :  { %s746_s29 = scalar_lea.vmem %s48_s26, 2048  ;;  %p751_p2 = scmp.lt.s32.totalorder %s48_s26, %s48_s26 }
  0x26   :  { %p747_p1 = scmp.ne.s32.totalorder %s48_s26, %s746_s29  ;;  %p752_p3 = scmp.lt.s32.totalorder %s746_s29, %s746_s29 }
  0x28   :  { %p753_p4 = por %p752_p3, %p751_p2 }
  0x2a   :  { %p754_p5 = pnand %p753_p4, %p747_p1 }
  0x2c   :  { %757 = shalt.err (!%p754_p5)
}
  0x2d   :  { %53 = dma.hbm_to_vmem [thread:$0]  %s969_s3, 2048, %s48_s26, [#allocation6], %s807_s12, %s807_s12, %s808_s13  }
  0x2e   :  { %s766_s0 = scalar_lea.vmem %s76_s28, 2048  ;;  %p771_p7 = scmp.lt.s32.totalorder %s76_s28, %s76_s28 }
  0x2f   :  { %p767_p6 = scmp.ne.s32.totalorder %s76_s28, %s766_s0  ;;  %p772_p8 = scmp.lt.s32.totalorder %s766_s0, %s766_s0 }
  0x31   :  { %p773_p9 = por %p772_p8, %p771_p7 }
  0x33   :  { %p774_p10 = pnand %p773_p9, %p767_p6 }
  0x35   :  { %777 = shalt.err (!%p774_p10)
}
  0x36   :  { %81 = dma.hbm_to_vmem [thread:$0]  %s973_s7, 2048, %s76_s28, [#allocation9], %s807_s12, %s807_s12, %s808_s13  }
  0x37   :  { %798 = dma.done.wait [#allocation3], 128  }
  0x38   :  { %799 = vsyncadd [#allocation3], 4294967168 }
  0x39   :  { %800 = dma.done.wait [#allocation6], 2304  }
  0x3a   :  { %801 = vsyncadd [#allocation6], 4294964992 }
  0x3b   :  { %802 = dma.done.wait [#allocation9], 4096  }
  0x3c   :  { %803 = vsyncadd [#allocation9], 4294963200  ;;  %v813_v0 = vmov 0.0   ;;  %vm814_vm0 = vmmov 0   ;;  %v101_v1 = vld [vmem:[#allocation5 + $0x8] sm:$0xff]  ;;  %v100_v2 = vld [vmem:[#allocation5] sm:$0xff] }
  0x3d   :  { %552 = vmatprep.subr.mxu0 %v813_v0  ;;  %556 = vmatprep.mubr.msk.f32.mxu0 %vm814_vm0, %v813_v0  ;;  %v99_v3 = vld [vmem:[#allocation2] sm:$0xff]  ;;  %vm109_vm1 = vcmask 130048   ;;  %v199_v4 = vld [vmem:[#allocation7 + $0x78] sm:$0xff]  ;;  %v198_v5 = vld [vmem:[#allocation7 + $0x70] sm:$0xff] }
  0x3e   :  { %559 = vmatprep.subr.mxu1 %v813_v0  ;;  %591 = vmatprep.mubr.msk.f32.mxu1 %vm814_vm0, %v813_v0  ;;  %v197_v6 = vld [vmem:[#allocation7 + $0x68] sm:$0xff]  ;;  %v196_v7 = vld [vmem:[#allocation7 + $0x60] sm:$0xff]  ;;  %v195_v8 = vld [vmem:[#allocation7 + $0x58] sm:$0xff] }
  0x3f   :  { %553 = vmatpush3.msra.mxu0 %v101_v1  ;;  %560 = vmatpush3.msra.mxu1 %v199_v4  ;;  %v194_v9 = vld [vmem:[#allocation7 + $0x50] sm:$0xff]  ;;  %v193_v10 = vld [vmem:[#allocation7 + $0x48] sm:$0xff]  ;;  %v192_v11 = vld [vmem:[#allocation7 + $0x40] sm:$0xff] }
  0x40   :  { %554 = vmatprep.subr.mxu0 %v813_v0  ;;  %561 = vmatprep.subr.mxu1 %v813_v0  ;;  %v191_v12 = vld [vmem:[#allocation7 + $0x38] sm:$0xff]  ;;  %v190_v13 = vld [vmem:[#allocation7 + $0x30] sm:$0xff]  ;;  %v189_v14 = vld [vmem:[#allocation7 + $0x28] sm:$0xff] }
  0x41   :  { %555 = vmatpush3.msra.mxu0 %v100_v2  ;;  %562 = vmatpush3.msra.mxu1 %v198_v5  ;;  %v188_v15 = vld [vmem:[#allocation7 + $0x20] sm:$0xff]  ;;  %v187_v16 = vld [vmem:[#allocation7 + $0x18] sm:$0xff]  ;;  %v186_v17 = vld [vmem:[#allocation7 + $0x10] sm:$0xff] }
  0x42   :  { %557 = vmatmul.mubr.msk.f32.vlgmr.msra.gmra.mxu0 %vm109_vm1, %v99_v3  ;;  %563 = vmatprep.subr.mxu1 %v813_v0  ;;  %v185_v18 = vld [vmem:[#allocation7 + $0x8] sm:$0xff]  ;;  %v184_v19 = vld [vmem:[#allocation7] sm:$0xff]  ;;  %v293_v20 = vld [vmem:[#allocation8 + $0x78] sm:$0xff] }
  0x43   :  { %594 = vmatprep.subr.mxu0 %v813_v0  ;;  %564 = vmatpush3.msra.mxu1 %v197_v6  ;;  %v292_v21 = vld [vmem:[#allocation8 + $0x70] sm:$0xff]  ;;  %v291_v22 = vld [vmem:[#allocation8 + $0x68] sm:$0xff]  ;;  %v290_v23 = vld [vmem:[#allocation8 + $0x60] sm:$0xff] }
  0x44   :  { %626 = vmatprep.mubr.msk.f32.mxu0 %vm814_vm0, %v813_v0  ;;  %565 = vmatprep.subr.mxu1 %v813_v0  ;;  %v289_v24 = vld [vmem:[#allocation8 + $0x58] sm:$0xff]  ;;  %v288_v25 = vld [vmem:[#allocation8 + $0x50] sm:$0xff]  ;;  %v287_v26 = vld [vmem:[#allocation8 + $0x48] sm:$0xff] }
  0x45   :  { %566 = vmatpush3.msra.mxu1 %v196_v7  ;;  %595 = vmatpush3.msra.mxu0 %v293_v20  ;;  %v286_v27 = vld [vmem:[#allocation8 + $0x40] sm:$0xff]  ;;  %v285_v28 = vld [vmem:[#allocation8 + $0x38] sm:$0xff]  ;;  %v284_v29 = vld [vmem:[#allocation8 + $0x30] sm:$0xff] }
  0x46   :  { %567 = vmatprep.subr.mxu1 %v813_v0  ;;  %596 = vmatprep.subr.mxu0 %v813_v0  ;;  %v283_v30 = vld [vmem:[#allocation8 + $0x28] sm:$0xff]  ;;  %v282_v31 = vld [vmem:[#allocation8 + $0x20] sm:$0xff]  ;;  %v281_v32 = vld [vmem:[#allocation8 + $0x18] sm:$0xff] }
  0x47   :  { %568 = vmatpush3.msra.mxu1 %v195_v8  ;;  %597 = vmatpush3.msra.mxu0 %v292_v21  ;;  %v493_v33 = vld [vmem:[%s968_s2] ss:$0 sm:$0xff]  ;;  %v280_v38 = vld [vmem:[#allocation8 + $0x10] sm:$0xff]  ;;  %v278_v40 = vld [vmem:[#allocation8] sm:$0xff] }
  0x48   :  { %569 = vmatprep.subr.mxu1 %v813_v0  ;;  %598 = vmatprep.subr.mxu0 %v813_v0  ;;  %v279_v39 = vld [vmem:[#allocation8 + $0x8] sm:$0xff]  ;;  %v387_v41 = vld [vmem:[#allocation10 + $0x78] sm:$0xff]  ;;  %v386_v42 = vld [vmem:[#allocation10 + $0x70] sm:$0xff] }
  0x49   :  { %570 = vmatpush3.msra.mxu1 %v194_v9  ;;  %599 = vmatpush3.msra.mxu0 %v291_v22  ;;  %v385_v43 = vld [vmem:[#allocation10 + $0x68] sm:$0xff]  ;;  %v384_v44 = vld [vmem:[#allocation10 + $0x60] sm:$0xff]  ;;  %v383_v45 = vld [vmem:[#allocation10 + $0x58] sm:$0xff] }
  0x4a   :  { %571 = vmatprep.subr.mxu1 %v813_v0  ;;  %600 = vmatprep.subr.mxu0 %v813_v0  ;;  %v382_v46 = vld [vmem:[#allocation10 + $0x50] sm:$0xff]  ;;  %v381_v47 = vld [vmem:[#allocation10 + $0x48] sm:$0xff]  ;;  %v380_v48 = vld [vmem:[#allocation10 + $0x40] sm:$0xff] }
  0x4b   :  { %572 = vmatpush3.msra.mxu1 %v193_v10  ;;  %601 = vmatpush3.msra.mxu0 %v290_v23  ;;  %v379_v49 = vld [vmem:[#allocation10 + $0x38] sm:$0xff]  ;;  %v378_v50 = vld [vmem:[#allocation10 + $0x30] sm:$0xff]  ;;  %v377_v51 = vld [vmem:[#allocation10 + $0x28] sm:$0xff] }
  0x4c   :  { %573 = vmatprep.subr.mxu1 %v813_v0  ;;  %602 = vmatprep.subr.mxu0 %v813_v0  ;;  %v376_v52 = vld [vmem:[#allocation10 + $0x20] sm:$0xff]  ;;  %v375_v53 = vld [vmem:[#allocation10 + $0x18] sm:$0xff]  ;;  %v495_v54 = vld [vmem:[%s970_s4] ss:$0 sm:$0xff] }
  0x4d   :  { %574 = vmatpush3.msra.mxu1 %v192_v11  ;;  %603 = vmatpush3.msra.mxu0 %v289_v24  ;;  %v374_v59 = vld [vmem:[#allocation10 + $0x10] sm:$0xff]  ;;  %v373_v60 = vld [vmem:[#allocation10 + $0x8] sm:$0xff]  ;;  %v372_v61 = vld [vmem:[#allocation10] sm:$0xff] }
  0x4e   :  { %575 = vmatprep.subr.mxu1 %v813_v0  ;;  %604 = vmatprep.subr.mxu0 %v813_v0  ;;  %v496_v62 = vld [vmem:[%s972_s6] ss:$0 sm:$0xff]  ;;  %s815_s6 = smov [#allocation11]  }
  0x4f   :  { %576 = vmatpush3.msra.mxu1 %v191_v12  ;;  %605 = vmatpush3.msra.mxu0 %v288_v25  ;;  %v497_v4 = vld [vmem:[%s974_s8] ss:$0 sm:$0xff]  ;;  %s482_s16 = sshll.u32 %s815_s6, 4  ;;  %s483_s16 = int_to_ptr.vmem [resolvable:$true] %s482_s16 }
  0x50   :  { %577 = vmatprep.subr.mxu1 %v813_v0  ;;  %606 = vmatprep.subr.mxu0 %v813_v0  ;;  %s778_s17 = scalar_lea.vmem %s483_s16, 128  ;;  %p783_p12 = scmp.lt.s32.totalorder %s483_s16, %s483_s16 }
  0x51   :  { %578 = vmatpush3.msra.mxu1 %v190_v13  ;;  %607 = vmatpush3.msra.mxu0 %v287_v26  ;;  %p779_p11 = scmp.ne.s32.totalorder %s483_s16, %s778_s17  ;;  %p784_p13 = scmp.lt.s32.totalorder %s778_s17, %s778_s17 }
  0x52   :  { %579 = vmatprep.subr.mxu1 %v813_v0  ;;  %608 = vmatprep.subr.mxu0 %v813_v0 }
  0x53   :  { %580 = vmatpush3.msra.mxu1 %v189_v14  ;;  %609 = vmatpush3.msra.mxu0 %v286_v27  ;;  %p785_p0 = por %p784_p13, %p783_p12 }
  0x54   :  { %581 = vmatprep.subr.mxu1 %v813_v0  ;;  %610 = vmatprep.subr.mxu0 %v813_v0 }
  0x55   :  { %582 = vmatpush3.msra.mxu1 %v188_v15  ;;  %611 = vmatpush3.msra.mxu0 %v285_v28  ;;  %p786_p1 = pnand %p785_p0, %p779_p11 }
  0x56   :  { %583 = vmatprep.subr.mxu1 %v813_v0  ;;  %612 = vmatprep.subr.mxu0 %v813_v0 }
  0x57   :  { %584 = vmatpush3.msra.mxu1 %v187_v16  ;;  %613 = vmatpush3.msra.mxu0 %v284_v29 }
  0x58   :  { %585 = vmatprep.subr.mxu1 %v813_v0  ;;  %614 = vmatprep.subr.mxu0 %v813_v0 }
  0x59   :  { %586 = vmatpush3.msra.mxu1 %v186_v17  ;;  %615 = vmatpush3.msra.mxu0 %v283_v30 }
  0x5a   :  { %587 = vmatprep.subr.mxu1 %v813_v0  ;;  %616 = vmatprep.subr.mxu0 %v813_v0 }
  0x5b   :  { %588 = vmatpush3.msra.mxu1 %v185_v18  ;;  %617 = vmatpush3.msra.mxu0 %v282_v31 }
  0x5c   :  { %589 = vmatprep.subr.mxu1 %v813_v0  ;;  %618 = vmatprep.subr.mxu0 %v813_v0 }
  0x5d   :  { %590 = vmatpush3.msra.mxu1 %v184_v19  ;;  %619 = vmatpush3.msra.mxu0 %v281_v32 }
  0x5e   :  { %629 = vmatprep.subr.mxu1 %v813_v0  ;;  %620 = vmatprep.subr.mxu0 %v813_v0 }
  0x5f   :  { %621 = vmatpush3.msra.mxu0 %v280_v38 }
  0x60   :  { %622 = vmatprep.subr.mxu0 %v813_v0 }
  0x61   :  { %623 = vmatpush3.msra.mxu0 %v279_v39 }
  0x62   :  { %624 = vmatprep.subr.mxu0 %v813_v0 }
  0x63   :  { %625 = vmatpush3.msra.mxu0 %v278_v40 }
 0x102   :  { %v179_v34 = vpop.f32.mrf.mxu0 }
 0x103   :  { %v180_v35 = vadd.f32 %v493_v33, %v179_v34 }
 0x104   :  { %v558_v36 = vpop.f32.mrf.mxu0 }
 0x105   :  { %v183_v37 = vmax.f32 %v180_v35, 0.0 }
 0x107   :  { %592 = vmatmul.mubr.f32.vlgmr.msra.gmra.mxu1 %v183_v37 }
 0x108   :  { %661 = vmatprep.mubr.msk.f32.mxu1 %vm814_vm0, %v813_v0  ;;  %630 = vmatpush3.msra.mxu1 %v387_v41 }
 0x109   :  { %631 = vmatprep.subr.mxu1 %v813_v0 }
 0x10a   :  { %632 = vmatpush3.msra.mxu1 %v386_v42 }
 0x10b   :  { %633 = vmatprep.subr.mxu1 %v813_v0 }
 0x10c   :  { %634 = vmatpush3.msra.mxu1 %v385_v43 }
 0x10d   :  { %635 = vmatprep.subr.mxu1 %v813_v0 }
 0x10e   :  { %636 = vmatpush3.msra.mxu1 %v384_v44 }
 0x10f   :  { %637 = vmatprep.subr.mxu1 %v813_v0 }
 0x110   :  { %638 = vmatpush3.msra.mxu1 %v383_v45 }
 0x111   :  { %639 = vmatprep.subr.mxu1 %v813_v0 }
 0x112   :  { %640 = vmatpush3.msra.mxu1 %v382_v46 }
 0x113   :  { %641 = vmatprep.subr.mxu1 %v813_v0 }
 0x114   :  { %642 = vmatpush3.msra.mxu1 %v381_v47 }
 0x115   :  { %643 = vmatprep.subr.mxu1 %v813_v0 }
 0x116   :  { %644 = vmatpush3.msra.mxu1 %v380_v48 }
 0x117   :  { %645 = vmatprep.subr.mxu1 %v813_v0 }
 0x118   :  { %646 = vmatpush3.msra.mxu1 %v379_v49 }
 0x119   :  { %647 = vmatprep.subr.mxu1 %v813_v0 }
 0x11a   :  { %648 = vmatpush3.msra.mxu1 %v378_v50 }
 0x11b   :  { %649 = vmatprep.subr.mxu1 %v813_v0 }
 0x11c   :  { %650 = vmatpush3.msra.mxu1 %v377_v51 }
 0x11d   :  { %651 = vmatprep.subr.mxu1 %v813_v0 }
 0x11e   :  { %652 = vmatpush3.msra.mxu1 %v376_v52 }
 0x11f   :  { %653 = vmatprep.subr.mxu1 %v813_v0 }
 0x120   :  { %654 = vmatpush3.msra.mxu1 %v375_v53 }
 0x121   :  { %655 = vmatprep.subr.mxu1 %v813_v0 }
 0x122   :  { %656 = vmatpush3.msra.mxu1 %v374_v59 }
 0x123   :  { %657 = vmatprep.subr.mxu1 %v813_v0 }
 0x124   :  { %658 = vmatpush3.msra.mxu1 %v373_v60 }
 0x125   :  { %659 = vmatprep.subr.mxu1 %v813_v0 }
 0x126   :  { %660 = vmatpush3.msra.mxu1 %v372_v61 }
 0x1c7   :  { %v273_v55 = vpop.f32.mrf.mxu1 }
 0x1c8   :  { %v274_v56 = vadd.f32 %v495_v54, %v273_v55 }
 0x1c9   :  { %v593_v57 = vpop.f32.mrf.mxu1 }
 0x1ca   :  { %v277_v58 = vmax.f32 %v274_v56, 0.0 }
 0x1cc   :  { %627 = vmatmul.mubr.f32.vlgmr.msra.gmra.mxu0 %v277_v58 }
 0x28c   :  { %v367_v63 = vpop.f32.mrf.mxu0 }
 0x28d   :  { %v368_v1 = vadd.f32 %v496_v62, %v367_v63 }
 0x28e   :  { %v628_v2 = vpop.f32.mrf.mxu0 }
 0x28f   :  { %v371_v3 = vmax.f32 %v368_v1, 0.0 }
 0x291   :  { %662 = vmatmul.mubr.f32.vlgmr.msra.gmra.mxu1 %v371_v3 }
 0x351   :  { %v461_v5 = vpop.f32.mrf.mxu1 }
 0x352   :  { %v462_v6 = vadd.f32 %v497_v4, %v461_v5 }
 0x353   :  { %v663_v7 = vpop.f32.mrf.mxu1 }
 0x354   :  { %465 = vmax.xlane.f32.xlu0 %v462_v6 }
 0x3dd   :  { %v466_v0 = vpop.xlane.xlu0 %465 }
 0x3de   :  { %v467_v8 = vsub.f32 %v462_v6, %v466_v0 }
 0x3e0   :  { %v468_v9 = vmul.f32 1.442695, %v467_v8 }
 0x3e2   :  { %674 = vpow2.f32 %v468_v9 }
 0x3ef   :  { %v675_v10 = vpop.eup %674 }
 0x3f0   :  { %470 = vadd.xlane.f32.xlu0 %v675_v10 }
 0x479   :  { %v471_v11 = vpop.xlane.xlu0 %470 }
 0x47a   :  { %676 = vrcp.f32 %v471_v11 }
 0x487   :  { %v677_v12 = vpop.eup %676 }
 0x488   :  { %v474_v13 = vmul.f32 %v677_v12, %v675_v10 }
 0x48a   :  { %475 = vst [vmem:[#allocation11] sm:$0xff] %v474_v13 }
 0x48b   :  { %789 = shalt.err (!%p786_p1)
}
 0x48c   :  { %485 = dma.vmem_to_hbm [thread:$0]  %s483_s16, 128, %s975_s9, [#allocation4]  }
 0x48d   :  { %804 = dma.done.wait [#allocation4], 128  }
 0x48e   :  { %805 = vsyncadd [#allocation4], 4294967168 }
 0x48f   :  { %489 = vsyncpa [#allocation3], 1 }
 0x490   :  { %490 = vsyncpa [#allocation6], 1 }
 0x491   :  { %491 = vsyncpa [#allocation9], 1 }
 0x492   :  { %492 = vsyncpa [#allocation4], 1 }

</bundles_post_ra>
